<compile_context>
chip_gen: v6e
topology: v6e:2x2x1
jax: 0.10.0
libtpu: 0.0.40
codegen_flags: <defaults>
</compile_context>

<pallas_src>
import functools

import jax
import jax.numpy as jnp
from jax.experimental import pallas as pl
from jax.experimental.pallas import tpu as pltpu

LANES = 128      # TPU lane width; padded feature width for all hidden/out dims
D_IN = 28 * 28   # 784
D_H1 = 120
D_H2 = 84
D_OUT = 10


def mlp_kernel(x_ref, w1_ref, b1_ref, w2_ref, b2_ref, w3_ref, b3_ref, o_ref):
    # x_ref: (TB, 784) f32 | w1: (784,128) bf16 | w2,w3: (128,128) bf16
    # b1,b2,b3: (1,128) f32 | o_ref: (TB, 128) bf16
    # Cast x to bf16 on the VPU (free slot in an HBM-bound kernel).
    x = x_ref[...].astype(jnp.bfloat16)

    # Layer 1: bf16 operands, f32 accumulation on the MXU, bias/ReLU in f32.
    h1 = jnp.dot(x, w1_ref[...], preferred_element_type=jnp.float32) + b1_ref[...]
    h1 = jnp.maximum(h1, 0.0).astype(jnp.bfloat16)

    # Layer 2 (tiny, VMEM-resident weights, bf16 operands / f32 accumulate).
    h2 = jnp.dot(h1, w2_ref[...], preferred_element_type=jnp.float32) + b2_ref[...]
    h2 = jnp.maximum(h2, 0.0).astype(jnp.bfloat16)

    # Layer 3 (no activation).  Output tile is lane-dense (128 wide), bf16.
    h3 = jnp.dot(h2, w3_ref[...], preferred_element_type=jnp.float32) + b3_ref[...]
    o_ref[...] = h3.astype(o_ref.dtype)


def _pad_to(a, shape):
    return jnp.pad(a, [(0, t - s) for s, t in zip(a.shape, shape)])


@functools.partial(jax.jit, static_argnames=("tb",))
def mlp_forward(x_nchw, params, *, tb=1024):
    """x_nchw: (B, 1, 28, 28) f32.  params: unpadded (in,out)-layout weights.

    tb: batch tile.  1024 fits v5e's 16 MiB default scoped VMEM; on v6e/v7x
    2048 (even tile count on v7x for megacore balance) is also a good choice.
    """
    w1, b1, w2, b2, w3, b3 = params

    # Zero-pad feature dims to 128 lanes (padded weight rows/cols and bias
    # lanes are zero, so the math is unchanged).  Matmul operands in bf16.
    w1p = _pad_to(w1, (D_IN, LANES)).astype(jnp.bfloat16)    # (784, 128) bf16
    b1p = _pad_to(b1, (1, LANES))                            # (1, 128) f32
    w2p = _pad_to(w2, (LANES, LANES)).astype(jnp.bfloat16)   # (128, 128) bf16
    b2p = _pad_to(b2, (1, LANES))
    w3p = _pad_to(w3, (LANES, LANES)).astype(jnp.bfloat16)   # (128, 128) bf16
    b3p = _pad_to(b3, (1, LANES))

    B = x_nchw.shape[0]
    x = x_nchw.reshape(B, D_IN)   # view(-1, 784); stays f32 — cast is in-kernel

    # Small batches: shrink the tile to the (sublane-padded) batch instead of
    # DMA-ing / computing a full tb-row tile of padding.
    tb_eff = tb if B > tb else max(8, ((B + 7) // 8) * 8)
    n_tiles = pl.cdiv(B, tb_eff)
    b_pad = n_tiles * tb_eff
    if b_pad != B:
        # NOTE: for large B prefer a tb that divides B — this pad is an extra
        # HBM read+write pass of x.
        x = jnp.pad(x, ((0, b_pad - B), (0, 0)))

    resident = lambda shape: pl.BlockSpec(shape, lambda i: (0, 0))

    flops = 2 * b_pad * (D_IN * LANES + 2 * LANES * LANES)
    bytes_accessed = (
        b_pad * (D_IN * 4 + LANES * 2)                       # x read + out write
        + D_IN * LANES * 2 + 2 * LANES * LANES * 2           # bf16 weights
        + 3 * LANES * 4                                      # f32 biases
    )

    out = pl.pallas_call(
        mlp_kernel,
        out_shape=jax.ShapeDtypeStruct((b_pad, LANES), jnp.bfloat16),
        grid_spec=pl.GridSpec(
            grid=(n_tiles,),
            in_specs=[
                pl.BlockSpec((tb_eff, D_IN), lambda i: (i, 0)),  # x: batch-tiled
                resident((D_IN, LANES)),                         # w1 (bf16)
                resident((1, LANES)),                            # b1
                resident((LANES, LANES)),                        # w2 (bf16)
                resident((1, LANES)),                            # b2
                resident((LANES, LANES)),                        # w3 (bf16)
                resident((1, LANES)),                            # b3
            ],
            out_specs=pl.BlockSpec((tb_eff, LANES), lambda i: (i, 0)),
        ),
        compiler_params=pltpu.CompilerParams(
            dimension_semantics=("parallel",),                   # megacore on v7x
            vmem_limit_bytes=32 * 1024 * 1024,                   # headroom for tb>=1024
        ),
        cost_estimate=pl.CostEstimate(
            flops=flops, transcendentals=0, bytes_accessed=bytes_accessed),
    )(x, w1p, b1p, w2p, b2p, w3p, b3p)

    # Slice off batch padding and the padded output lanes; return f32 logits
    # to match the nn.Module's output dtype.
    return out[:B, :D_OUT].astype(jnp.float32)


def init_params(key):
    """Deterministic init matching nn.Linear shapes (stored transposed (in,out))."""
    ks = jax.random.split(key, 6)

    def linear(kw, kb, fan_in, fan_out):
        bound = 1.0 / (fan_in ** 0.5)
        w = jax.random.uniform(kw, (fan_in, fan_out), jnp.float32, -bound, bound)
        b = jax.random.uniform(kb, (1, fan_out), jnp.float32, -bound, bound)
        return w, b

    w1, b1 = linear(ks[0], ks[1], D_IN, D_H1)
    w2, b2 = linear(ks[2], ks[3], D_H1, D_H2)
    w3, b3 = linear(ks[4], ks[5], D_H2, D_OUT)
    return (w1, b1, w2, b2, w3, b3)


def reference_forward(x_nchw, params, *, quantized=False):
    """Pure-JAX reference.  quantized=True mimics the kernel's bf16 data path."""
    w1, b1, w2, b2, w3, b3 = params
    x = x_nchw.reshape(x_nchw.shape[0], -1)
    if quantized:
        bf = lambda a: a.astype(jnp.bfloat16)
        h = jax.nn.relu(jnp.dot(bf(x), bf(w1), preferred_element_type=jnp.float32) + b1)
        h = jax.nn.relu(jnp.dot(bf(h), bf(w2), preferred_element_type=jnp.float32) + b2)
        out = jnp.dot(bf(h), bf(w3), preferred_element_type=jnp.float32) + b3
        return out.astype(jnp.bfloat16).astype(jnp.float32)
    h = jax.nn.relu(x @ w1 + b1)
    h = jax.nn.relu(h @ w2 + b2)
    return h @ w3 + b3


if __name__ == "__main__":
    key = jax.random.PRNGKey(0)
    k_x, k_p = jax.random.split(key)

    B = 8
    x = jax.random.normal(k_x, (B, 1, 28, 28), dtype=jnp.float32)  # NCHW like MNIST
    params = init_params(k_p)

    out = jax.block_until_ready(mlp_forward(x, params))
    assert out.shape == (B, D_OUT)

    # Check against a reference using the same bf16 quantization path.
    ref_q = reference_forward(x, params, quantized=True)
    assert jnp.allclose(out, ref_q, atol=2e-2, rtol=2e-2)

    # Loose sanity check against the pure-f32 module semantics.
    ref_f32 = reference_forward(x, params)
    assert jnp.allclose(out, ref_f32, atol=1e-1, rtol=1e-1)

    print("KERNEL_OK")
</pallas_src>

<mosaic_0001>
module attributes {stable_mosaic.version = 11 : i64} {
  func.func @mlp_kernel(%arg0: i32, %arg1: memref<8x784xf32, #tpu.memory_space<vmem>>, %arg2: memref<784x128xbf16, #tpu.memory_space<vmem>>, %arg3: memref<1x128xf32, #tpu.memory_space<vmem>>, %arg4: memref<128x128xbf16, #tpu.memory_space<vmem>>, %arg5: memref<1x128xf32, #tpu.memory_space<vmem>>, %arg6: memref<128x128xbf16, #tpu.memory_space<vmem>>, %arg7: memref<1x128xf32, #tpu.memory_space<vmem>>, %arg8: memref<8x128xbf16, #tpu.memory_space<vmem>>) attributes {dimension_semantics = [#tpu.dimension_semantics<parallel>], iteration_bounds = array<i64: 1>, scalar_prefetch = 0 : i64, scratch_operands = 0 : i64, tpu.core_type = #tpu.core_type<tc>, window_params = [{transform_indices = @transform_0, window_bounds = array<i64: 8, 784>}, {pipeline_mode = #tpu.pipeline_mode<synchronous>, transform_indices = @transform_1, window_bounds = array<i64: 784, 128>}, {pipeline_mode = #tpu.pipeline_mode<synchronous>, transform_indices = @transform_2, window_bounds = array<i64: 1, 128>}, {pipeline_mode = #tpu.pipeline_mode<synchronous>, transform_indices = @transform_3, window_bounds = array<i64: 128, 128>}, {pipeline_mode = #tpu.pipeline_mode<synchronous>, transform_indices = @transform_4, window_bounds = array<i64: 1, 128>}, {pipeline_mode = #tpu.pipeline_mode<synchronous>, transform_indices = @transform_5, window_bounds = array<i64: 128, 128>}, {pipeline_mode = #tpu.pipeline_mode<synchronous>, transform_indices = @transform_6, window_bounds = array<i64: 1, 128>}, {transform_indices = @transform_7, window_bounds = array<i64: 8, 128>}]} {
    %c0 = arith.constant 0 : index
    %c0_0 = arith.constant 0 : index
    %0 = vector.load %arg1[%c0, %c0_0] : memref<8x784xf32, #tpu.memory_space<vmem>>, vector<8x784xf32>
    %1 = arith.truncf %0 : vector<8x784xf32> to vector<8x784xbf16>
    %c0_1 = arith.constant 0 : index
    %c0_2 = arith.constant 0 : index
    %2 = vector.load %arg2[%c0_1, %c0_2] : memref<784x128xbf16, #tpu.memory_space<vmem>>, vector<784x128xbf16>
    %cst = arith.constant dense<0.000000e+00> : vector<8x128xf32>
    %3 = tpu.matmul %1, %2, %cst {dimension_numbers = #tpu.dot_dimension_numbers<[1], [0], [0], [1], [0, 0, 1, 1], [], []>} : vector<8x784xbf16>, vector<784x128xbf16>, vector<8x128xf32> -> vector<8x128xf32>
    %c0_3 = arith.constant 0 : index
    %c0_4 = arith.constant 0 : index
    %4 = vector.load %arg3[%c0_3, %c0_4] : memref<1x128xf32, #tpu.memory_space<vmem>>, vector<1x128xf32>
    %5 = vector.broadcast %4 : vector<1x128xf32> to vector<8x128xf32>
    %6 = arith.addf %3, %5 : vector<8x128xf32>
    %cst_5 = arith.constant 0.000000e+00 : f32
    %7 = vector.broadcast %cst_5 : f32 to vector<8x128xf32>
    %8 = arith.maximumf %6, %7 : vector<8x128xf32>
    %9 = arith.truncf %8 : vector<8x128xf32> to vector<8x128xbf16>
    %c0_6 = arith.constant 0 : index
    %c0_7 = arith.constant 0 : index
    %10 = vector.load %arg4[%c0_6, %c0_7] : memref<128x128xbf16, #tpu.memory_space<vmem>>, vector<128x128xbf16>
    %cst_8 = arith.constant dense<0.000000e+00> : vector<8x128xf32>
    %11 = tpu.matmul %9, %10, %cst_8 {dimension_numbers = #tpu.dot_dimension_numbers<[1], [0], [0], [1], [0, 0, 1, 1], [], []>} : vector<8x128xbf16>, vector<128x128xbf16>, vector<8x128xf32> -> vector<8x128xf32>
    %c0_9 = arith.constant 0 : index
    %c0_10 = arith.constant 0 : index
    %12 = vector.load %arg5[%c0_9, %c0_10] : memref<1x128xf32, #tpu.memory_space<vmem>>, vector<1x128xf32>
    %13 = vector.broadcast %12 : vector<1x128xf32> to vector<8x128xf32>
    %14 = arith.addf %11, %13 : vector<8x128xf32>
    %cst_11 = arith.constant 0.000000e+00 : f32
    %15 = vector.broadcast %cst_11 : f32 to vector<8x128xf32>
    %16 = arith.maximumf %14, %15 : vector<8x128xf32>
    %17 = arith.truncf %16 : vector<8x128xf32> to vector<8x128xbf16>
    %c0_12 = arith.constant 0 : index
    %c0_13 = arith.constant 0 : index
    %18 = vector.load %arg6[%c0_12, %c0_13] : memref<128x128xbf16, #tpu.memory_space<vmem>>, vector<128x128xbf16>
    %cst_14 = arith.constant dense<0.000000e+00> : vector<8x128xf32>
    %19 = tpu.matmul %17, %18, %cst_14 {dimension_numbers = #tpu.dot_dimension_numbers<[1], [0], [0], [1], [0, 0, 1, 1], [], []>} : vector<8x128xbf16>, vector<128x128xbf16>, vector<8x128xf32> -> vector<8x128xf32>
    %c0_15 = arith.constant 0 : index
    %c0_16 = arith.constant 0 : index
    %20 = vector.load %arg7[%c0_15, %c0_16] : memref<1x128xf32, #tpu.memory_space<vmem>>, vector<1x128xf32>
    %21 = vector.broadcast %20 : vector<1x128xf32> to vector<8x128xf32>
    %22 = arith.addf %19, %21 : vector<8x128xf32>
    %23 = arith.truncf %22 : vector<8x128xf32> to vector<8x128xbf16>
    %c0_17 = arith.constant 0 : index
    %c0_18 = arith.constant 0 : index
    %24 = vector.load %arg8[%c0_17, %c0_18] : memref<8x128xbf16, #tpu.memory_space<vmem>>, vector<8x128xbf16>
    tpu.vector_store %arg8[%c0_17, %c0_18], %23 {strides = array<i32>} : memref<8x128xbf16, #tpu.memory_space<vmem>>, vector<8x128xbf16>,
    return
  }
  func.func @transform_0(%arg0: i32) -> (i32, i32) {
    %c0_i32 = arith.constant 0 : i32
    %c0_i32_0 = arith.constant 0 : i32
    return %arg0, %c0_i32 : i32, i32
  }
  func.func @transform_1(%arg0: i32) -> (i32, i32) {
    %c0_i32 = arith.constant 0 : i32
    %c0_i32_0 = arith.constant 0 : i32
    %c0_i32_1 = arith.constant 0 : i32
    return %c0_i32, %c0_i32_0 : i32, i32
  }
  func.func @transform_2(%arg0: i32) -> (i32, i32) {
    %c0_i32 = arith.constant 0 : i32
    %c0_i32_0 = arith.constant 0 : i32
    %c0_i32_1 = arith.constant 0 : i32
    return %c0_i32, %c0_i32_0 : i32, i32
  }
  func.func @transform_3(%arg0: i32) -> (i32, i32) {
    %c0_i32 = arith.constant 0 : i32
    %c0_i32_0 = arith.constant 0 : i32
    %c0_i32_1 = arith.constant 0 : i32
    return %c0_i32, %c0_i32_0 : i32, i32
  }
  func.func @transform_4(%arg0: i32) -> (i32, i32) {
    %c0_i32 = arith.constant 0 : i32
    %c0_i32_0 = arith.constant 0 : i32
    %c0_i32_1 = arith.constant 0 : i32
    return %c0_i32, %c0_i32_0 : i32, i32
  }
  func.func @transform_5(%arg0: i32) -> (i32, i32) {
    %c0_i32 = arith.constant 0 : i32
    %c0_i32_0 = arith.constant 0 : i32
    %c0_i32_1 = arith.constant 0 : i32
    return %c0_i32, %c0_i32_0 : i32, i32
  }
  func.func @transform_6(%arg0: i32) -> (i32, i32) {
    %c0_i32 = arith.constant 0 : i32
    %c0_i32_0 = arith.constant 0 : i32
    %c0_i32_1 = arith.constant 0 : i32
    return %c0_i32, %c0_i32_0 : i32, i32
  }
  func.func @transform_7(%arg0: i32) -> (i32, i32) {
    %c0_i32 = arith.constant 0 : i32
    %c0_i32_0 = arith.constant 0 : i32
    return %arg0, %c0_i32 : i32, i32
  }
}

</mosaic_0001>

<bundles_post_ra>
// kernel: mlp_forward.1
= control target key start
LH: loop header
LB: loop body
LE: loop exit
PB: predicated region body
PF: predicated region fallthrough
CT: control target
= control target key end

     0   :  { %v1104_v44 = vmov 0.0   ;;  %vm1105_vm0 = vmmov 0   ;;  %vm440_vm1 = vcmask 130048   ;;  %s1397_s1 = inlined_call_operand.vmem [shape: bf16[784,128], index: 1, kind: input, shape index: {}]   ;;  %s1398_s0 = inlined_call_operand.vmem [shape: f32[8,784], index: 0, kind: input, shape index: {}]   ;;  %s1399_s3 = inlined_call_operand.vmem [shape: bf16[128,128], index: 3, kind: input, shape index: {}]   ;;  %s1400_s5 = inlined_call_operand.vmem [shape: bf16[128,128], index: 5, kind: input, shape index: {}]   ;;  %s1401_s2 = inlined_call_operand.vmem [shape: f32[1,128], index: 2, kind: input, shape index: {}]   ;;  %s1402_s4 = inlined_call_operand.vmem [shape: f32[1,128], index: 4, kind: input, shape index: {}]   ;;  %s1403_s6 = inlined_call_operand.vmem [shape: f32[1,128], index: 6, kind: input, shape index: {}]   ;;  %s1404_s7 = inlined_call_operand.vmem [shape: bf16[8,128], index: 7, kind: output, shape index: {}]  }
   0x1   :  { %v1039_v0 = vld [vmem:[%s1397_s1 + $0x78] sm:$0xff]   ;;  %v1043_v4 = vld [vmem:[%s1397_s1 + $0x70] sm:$0xff]   ;;  %v1047_v8 = vld [vmem:[%s1397_s1 + $0x68] sm:$0xff]  }
   0x2   :  { %v1040_v1 = vld [vmem:[%s1397_s1 + $0x38] sm:$0xff]   ;;  %905 = vmatprep.subr.bf16.mxu0 %v1039_v0  ;;  %v1044_v5 = vld [vmem:[%s1397_s1 + $0x30] sm:$0xff]   ;;  %v1048_v9 = vld [vmem:[%s1397_s1 + $0x28] sm:$0xff]  }
   0x3   :  { %v1041_v2 = vld [vmem:[%s1397_s1 + $0xf8] sm:$0xff]   ;;  %906 = vmatpush3.bf16.msra.mxu0 %v1040_v1  ;;  %v1045_v6 = vld [vmem:[%s1397_s1 + $0xf0] sm:$0xff]   ;;  %v1049_v10 = vld [vmem:[%s1397_s1 + $0xe8] sm:$0xff]  }
   0x4   :  { %v1042_v3 = vld [vmem:[%s1397_s1 + $0xb8] sm:$0xff]   ;;  %927 = vmatprep.subr.bf16.mxu1 %v1041_v2  ;;  %907 = vmatprep.subr.bf16.mxu0 %v1043_v4  ;;  %v1046_v7 = vld [vmem:[%s1397_s1 + $0xb0] sm:$0xff]   ;;  %v1050_v11 = vld [vmem:[%s1397_s1 + $0xa8] sm:$0xff]  }
   0x5   :  { %928 = vmatpush3.bf16.msra.mxu1 %v1042_v3  ;;  %v1051_v12 = vld [vmem:[%s1397_s1 + $0x60] sm:$0xff]   ;;  %v1055_v16 = vld [vmem:[%s1397_s1 + $0x58] sm:$0xff]   ;;  %v1059_v20 = vld [vmem:[%s1397_s1 + $0x50] sm:$0xff]  }
   0x6   :  { %929 = vmatprep.subr.bf16.mxu1 %v1045_v6  ;;  %v1052_v13 = vld [vmem:[%s1397_s1 + $0x20] sm:$0xff]   ;;  %v1056_v17 = vld [vmem:[%s1397_s1 + $0x18] sm:$0xff]   ;;  %v1060_v21 = vld [vmem:[%s1397_s1 + $0x10] sm:$0xff]  }
   0x7   :  { %908 = vmatpush3.bf16.msra.mxu0 %v1044_v5  ;;  %v1053_v14 = vld [vmem:[%s1397_s1 + $0xe0] sm:$0xff]   ;;  %v1057_v18 = vld [vmem:[%s1397_s1 + $0xd8] sm:$0xff]   ;;  %v1061_v22 = vld [vmem:[%s1397_s1 + $0xd0] sm:$0xff]  }
   0x8   :  { %909 = vmatprep.subr.bf16.mxu0 %v1047_v8  ;;  %v1054_v15 = vld [vmem:[%s1397_s1 + $0xa0] sm:$0xff]   ;;  %v1058_v19 = vld [vmem:[%s1397_s1 + $0x98] sm:$0xff]   ;;  %v1062_v23 = vld [vmem:[%s1397_s1 + $0x90] sm:$0xff]  }
   0x9   :  { %930 = vmatpush3.bf16.msra.mxu1 %v1046_v7  ;;  %v1063_v24 = vld [vmem:[%s1397_s1 + $0x48] sm:$0xff]   ;;  %v1067_v28 = vld [vmem:[%s1397_s1 + $0x40] sm:$0xff]   ;;  %v1071_v36 = vld [vmem:[%s1397_s1 + $0x178] sm:$0xff]  }
   0xa   :  { %931 = vmatprep.subr.bf16.mxu1 %v1049_v10  ;;  %v1064_v25 = vld [vmem:[%s1397_s1 + $0x8] sm:$0xff]   ;;  %v1068_v29 = vld [vmem:[%s1397_s1] sm:$0xff]   ;;  %v30_v37 = vld [vmem:[%s1398_s0 + $0x18] sm:$0xff] }
   0xb   :  { %910 = vmatpush3.bf16.msra.mxu0 %v1048_v9  ;;  %v1065_v26 = vld [vmem:[%s1397_s1 + $0xc8] sm:$0xff]   ;;  %v1069_v30 = vld [vmem:[%s1397_s1 + $0xc0] sm:$0xff]   ;;  %v37_v38 = vpack.c.bf16 %v30_v37, %v30_v37  ;;  %v1072_v39 = vld [vmem:[%s1397_s1 + $0x138] sm:$0xff]  }
   0xc   :  { %911 = vmatprep.subr.bf16.mxu0 %v1051_v12  ;;  %v1066_v27 = vld [vmem:[%s1397_s1 + $0x88] sm:$0xff]   ;;  %v1070_v33 = vld [vmem:[%s1397_s1 + $0x80] sm:$0xff]   ;;  %v29_v40 = vld [vmem:[%s1398_s0 + $0x10] sm:$0xff] }
   0xd   :  { %932 = vmatpush3.bf16.msra.mxu1 %v1050_v11  ;;  %v28_v31 = vld [vmem:[%s1398_s0 + $0x8] sm:$0xff]  ;;  %v27_v34 = vld [vmem:[%s1398_s0] sm:$0xff]  ;;  %516 = vmatprep.mubr.bf16.mxu1 %v37_v38  ;;  %v36_v41 = vpack.c.bf16 %v29_v40, %v29_v40  ;;  %v1073_v42 = vld [vmem:[%s1397_s1 + $0x170] sm:$0xff]  }
   0xe   :  { %933 = vmatprep.subr.bf16.mxu1 %v1053_v14  ;;  %v35_v32 = vpack.c.bf16 %v28_v31, %v28_v31  ;;  %v34_v35 = vpack.c.bf16 %v27_v34, %v27_v34  ;;  %v1074_v43 = vld [vmem:[%s1397_s1 + $0x130] sm:$0xff]   ;;  %v1075_v45 = vld [vmem:[%s1397_s1 + $0x168] sm:$0xff]   ;;  %v1077_v47 = vld [vmem:[%s1397_s1 + $0x160] sm:$0xff]  }
   0xf   :  { %912 = vmatpush3.bf16.msra.mxu0 %v1052_v13  ;;  %v1076_v46 = vld [vmem:[%s1397_s1 + $0x128] sm:$0xff]   ;;  %v1078_v48 = vld [vmem:[%s1397_s1 + $0x120] sm:$0xff]   ;;  %v1079_v49 = vld [vmem:[%s1397_s1 + $0x158] sm:$0xff]  }
  0x10   :  { %913 = vmatprep.subr.bf16.mxu0 %v1055_v16  ;;  %476 = vmatprep.mubr.bf16.mxu0 %v35_v32  ;;  %v1080_v50 = vld [vmem:[%s1397_s1 + $0x118] sm:$0xff]   ;;  %v1081_v51 = vld [vmem:[%s1397_s1 + $0x150] sm:$0xff]   ;;  %v1087_v52 = vld [vmem:[%s1397_s1 + $0x180] sm:$0xff]  }
  0x11   :  { %934 = vmatpush3.bf16.msra.mxu1 %v1054_v15  ;;  %v32_v53 = vld [vmem:[%s1398_s0 + $0x28] sm:$0xff]  ;;  %v33_v55 = vld [vmem:[%s1398_s0 + $0x30] sm:$0xff]  ;;  %v1085_v60 = vld [vmem:[%s1397_s1 + $0x140] sm:$0xff]  }
  0x12   :  { %935 = vmatprep.subr.bf16.mxu1 %v1057_v18  ;;  %v39_v54 = vpack.c.bf16 %v32_v53, %v32_v53  ;;  %v1082_v56 = vld [vmem:[%s1397_s1 + $0x110] sm:$0xff]   ;;  %v40_v57 = vpack.c.bf16 %v33_v55, %v33_v55  ;;  %v1083_v58 = vld [vmem:[%s1397_s1 + $0x148] sm:$0xff]   ;;  %v1086_v61 = vld [vmem:[%s1397_s1 + $0x100] sm:$0xff]  }
  0x13   :  { %914 = vmatpush3.bf16.msra.mxu0 %v1056_v17  ;;  %v1084_v59 = vld [vmem:[%s1397_s1 + $0x108] sm:$0xff]   ;;  %v31_v62 = vld [vmem:[%s1398_s0 + $0x20] sm:$0xff]  ;;  %v1088_v0 = vld [vmem:[%s1399_s3 + $0x38] sm:$0xff]  }
  0x14   :  { %915 = vmatprep.subr.bf16.mxu0 %v1059_v20  ;;  %v38_v63 = vpack.c.bf16 %v31_v62, %v31_v62  ;;  %v1089_v1 = vld [vmem:[%s1399_s3 + $0x30] sm:$0xff]   ;;  %v1090_v2 = vld [vmem:[%s1399_s3 + $0x28] sm:$0xff]   ;;  %v1091_v3 = vld [vmem:[%s1399_s3 + $0x20] sm:$0xff]  }
  0x15   :  { %936 = vmatpush3.bf16.msra.mxu1 %v1058_v19  ;;  %v1092_v4 = vld [vmem:[%s1399_s3 + $0x18] sm:$0xff]   ;;  %v1093_v5 = vld [vmem:[%s1399_s3 + $0x10] sm:$0xff]   ;;  %v1094_v6 = vld [vmem:[%s1399_s3 + $0x8] sm:$0xff]  }
  0x16   :  { %937 = vmatprep.subr.bf16.mxu1 %v1061_v22  ;;  %v1095_v7 = vld [vmem:[%s1399_s3] sm:$0xff]   ;;  %v1096_v8 = vld [vmem:[%s1400_s5 + $0x38] sm:$0xff]   ;;  %v1097_v9 = vld [vmem:[%s1400_s5 + $0x30] sm:$0xff]  }
  0x17   :  { %916 = vmatpush3.bf16.msra.mxu0 %v1060_v21  ;;  %v1098_v10 = vld [vmem:[%s1400_s5 + $0x28] sm:$0xff]   ;;  %v1099_v11 = vld [vmem:[%s1400_s5 + $0x20] sm:$0xff]   ;;  %v1100_v12 = vld [vmem:[%s1400_s5 + $0x18] sm:$0xff]  }
  0x18   :  { %917 = vmatprep.subr.bf16.mxu0 %v1063_v24  ;;  %v1101_v13 = vld [vmem:[%s1400_s5 + $0x10] sm:$0xff]   ;;  %v1102_v40 = vld [vmem:[%s1400_s5 + $0x8] sm:$0xff]  }
  0x19   :  { %938 = vmatpush3.bf16.msra.mxu1 %v1062_v23 }
  0x1a   :  { %939 = vmatprep.subr.bf16.mxu1 %v1065_v26 }
  0x1b   :  { %918 = vmatpush3.bf16.msra.mxu0 %v1064_v25 }
  0x1c   :  { %919 = vmatprep.subr.bf16.mxu0 %v1067_v28 }
  0x1d   :  { %940 = vmatpush3.bf16.msra.mxu1 %v1066_v27  ;;  %v836_v27 = vld [vmem:[%s1401_s2] ss:$0 sm:$0xff] }
  0x1e   :  { %941 = vmatprep.subr.bf16.mxu1 %v1069_v30 }
  0x1f   :  { %920 = vmatpush3.bf16.msra.mxu0 %v1068_v29 }
  0x20   :  { %949 = vmatprep.subr.bf16.mxu0 %v1071_v36 }
  0x21   :  { %942 = vmatpush3.bf16.msra.mxu1 %v1070_v33 }
  0x22   :  { %477 = vmatmul.mubr.bf16.vlgmr.msra.gmra.mxu0 %v34_v35  ;;  %991 = vmatprep.subr.bf16.mxu1 %v1104_v44 }
  0x23   :  { %950 = vmatpush3.bf16.msra.mxu0 %v1072_v39  ;;  %556 = vmatprep.mubr.bf16.mxu0 %v39_v54 }
  0x24   :  { %517 = vmatmul.mubr.bf16.vlgmr.msra.gmra.mxu1 %v36_v41  ;;  %951 = vmatprep.subr.bf16.mxu0 %v1073_v42  ;;  %v1103_v41 = vld [vmem:[%s1400_s5] sm:$0xff]  }
  0x25   :  { %993 = vmatprep.mubr.msk.bf16.mxu1 %vm1105_vm0, %v1104_v44  ;;  %992 = vmatpush3.bf16.msra.mxu1 %v1087_v52  ;;  %v887_v42 = vld [vmem:[%s1402_s4] ss:$0 sm:$0xff] }
  0x26   :  { %997 = vmatprep.subr.bf16.mxu1 %v1104_v44 }
  0x27   :  { %952 = vmatpush3.bf16.msra.mxu0 %v1074_v43 }
  0x28   :  { %953 = vmatprep.subr.bf16.mxu0 %v1075_v45 }
  0x2b   :  { %954 = vmatpush3.bf16.msra.mxu0 %v1076_v46 }
  0x2c   :  { %955 = vmatprep.subr.bf16.mxu0 %v1077_v47  ;;  %994 = vmatmul.mubr.msk.bf16.vlgmr.msra.gmra.mxu1 %vm440_vm1, %v40_v57 }
  0x2d   :  { %1013 = vmatprep.mubr.msk.bf16.mxu1 %vm1105_vm0, %v1104_v44  ;;  %998 = vmatpush3.bf16.msra.mxu1 %v1088_v0 }
  0x2e   :  { %999 = vmatprep.subr.bf16.mxu1 %v1104_v44 }
  0x2f   :  { %956 = vmatpush3.bf16.msra.mxu0 %v1078_v48 }
  0x30   :  { %957 = vmatprep.subr.bf16.mxu0 %v1079_v49 }
  0x31   :  { %1000 = vmatpush3.bf16.msra.mxu1 %v1089_v1 }
  0x32   :  { %1001 = vmatprep.subr.bf16.mxu1 %v1104_v44 }
  0x33   :  { %958 = vmatpush3.bf16.msra.mxu0 %v1080_v50 }
  0x34   :  { %959 = vmatprep.subr.bf16.mxu0 %v1081_v51 }
  0x35   :  { %1002 = vmatpush3.bf16.msra.mxu1 %v1090_v2 }
  0x36   :  { %1003 = vmatprep.subr.bf16.mxu1 %v1104_v44 }
  0x37   :  { %960 = vmatpush3.bf16.msra.mxu0 %v1082_v56 }
  0x38   :  { %961 = vmatprep.subr.bf16.mxu0 %v1083_v58 }
  0x39   :  { %1004 = vmatpush3.bf16.msra.mxu1 %v1091_v3 }
  0x3a   :  { %1005 = vmatprep.subr.bf16.mxu1 %v1104_v44 }
  0x3b   :  { %962 = vmatpush3.bf16.msra.mxu0 %v1084_v59 }
  0x3c   :  { %963 = vmatprep.subr.bf16.mxu0 %v1085_v60 }
  0x3d   :  { %1006 = vmatpush3.bf16.msra.mxu1 %v1092_v4 }
  0x3e   :  { %1007 = vmatprep.subr.bf16.mxu1 %v1104_v44 }
  0x3f   :  { %964 = vmatpush3.bf16.msra.mxu0 %v1086_v61 }
  0x40   :  { %1017 = vmatprep.subr.bf16.mxu0 %v1104_v44 }
  0x41   :  { %1008 = vmatpush3.bf16.msra.mxu1 %v1093_v5 }
  0x42   :  { %557 = vmatmul.mubr.bf16.vlgmr.msra.gmra.mxu0 %v38_v63  ;;  %1009 = vmatprep.subr.bf16.mxu1 %v1104_v44 }
  0x43   :  { %1033 = vmatprep.mubr.msk.bf16.mxu0 %vm1105_vm0, %v1104_v44  ;;  %1018 = vmatpush3.bf16.msra.mxu0 %v1096_v8 }
  0x44   :  { %1019 = vmatprep.subr.bf16.mxu0 %v1104_v44 }
  0x45   :  { %1010 = vmatpush3.bf16.msra.mxu1 %v1094_v6 }
  0x46   :  { %1011 = vmatprep.subr.bf16.mxu1 %v1104_v44 }
  0x47   :  { %1020 = vmatpush3.bf16.msra.mxu0 %v1097_v9 }
  0x48   :  { %1021 = vmatprep.subr.bf16.mxu0 %v1104_v44 }
  0x49   :  { %1012 = vmatpush3.bf16.msra.mxu1 %v1095_v7 }
  0x4b   :  { %1022 = vmatpush3.bf16.msra.mxu0 %v1098_v10 }
  0x4c   :  { %1023 = vmatprep.subr.bf16.mxu0 %v1104_v44 }
  0x4f   :  { %1024 = vmatpush3.bf16.msra.mxu0 %v1099_v11 }
  0x50   :  { %1025 = vmatprep.subr.bf16.mxu0 %v1104_v44 }
  0x53   :  { %1026 = vmatpush3.bf16.msra.mxu0 %v1100_v12 }
  0x54   :  { %1027 = vmatprep.subr.bf16.mxu0 %v1104_v44 }
  0x57   :  { %1028 = vmatpush3.bf16.msra.mxu0 %v1101_v13 }
  0x58   :  { %1029 = vmatprep.subr.bf16.mxu0 %v1104_v44 }
  0x5b   :  { %1030 = vmatpush3.bf16.msra.mxu0 %v1102_v40 }
  0x5c   :  { %1031 = vmatprep.subr.bf16.mxu0 %v1104_v44  ;;  %v896_v44 = vld [vmem:[%s1403_s6] ss:$0 sm:$0xff] }
  0x5f   :  { %1032 = vmatpush3.bf16.msra.mxu0 %v1103_v41 }
  0xe2   :  { %v921_v14 = vpop.f32.mrf.mxu0 }
  0xe4   :  { %v922_v15 = vpop.f32.mrf.mxu0  ;;  %v943_v16 = vpop.f32.mrf.mxu1 }
  0xe5   :  { %v923_v26 = vadd.f32 %v922_v15, %v921_v14 }
  0xe6   :  { %v924_v17 = vpop.f32.mrf.mxu0  ;;  %v944_v18 = vpop.f32.mrf.mxu1 }
  0xe7   :  { %v479_v28 = vadd.f32 %v923_v26, %v836_v27  ;;  %v945_v29 = vadd.f32 %v944_v18, %v943_v16 }
  0xe8   :  { %v925_v19 = vpop.f32.mrf.mxu0  ;;  %v946_v20 = vpop.f32.mrf.mxu1 }
  0xe9   :  { %v519_v32 = vadd.f32 %v945_v29, %v479_v28 }
  0xea   :  { %v947_v21 = vpop.f32.mrf.mxu1 }
  0xec   :  { %v598_v22 = vpop.f32.mrf.mxu1 }
  0xee   :  { %v995_v23 = vpop.f32.mrf.mxu1 }
  0xf0   :  { %v601_v24 = vpop.f32.mrf.mxu1 }
  0xf2   :  { %v996_v25 = vpop.f32.mrf.mxu1 }
 0x102   :  { %v965_v30 = vpop.f32.mrf.mxu0 }
 0x104   :  { %v966_v31 = vpop.f32.mrf.mxu0 }
 0x105   :  { %v967_v33 = vadd.f32 %v966_v31, %v965_v30 }
 0x106   :  { %v968_v34 = vpop.f32.mrf.mxu0 }
 0x107   :  { %v559_v35 = vadd.f32 %v967_v33, %v519_v32 }
 0x108   :  { %v969_v36 = vpop.f32.mrf.mxu0 }
 0x109   :  { %v599_v37 = vadd.f32 %v598_v22, %v559_v35 }
 0x10b   :  { %v604_v38 = vmax.f32 %v599_v37, 0.0 }
 0x10d   :  { %v605_v39 = vpack.c.bf16 %v604_v38, %v604_v38 }
 0x10f   :  { %1014 = vmatmul.mubr.bf16.vlgmr.msra.gmra.mxu1 %v605_v39 }
 0x1cf   :  { %v711_v43 = vpop.f32.mrf.mxu1 }
 0x1d0   :  { %v712_v45 = vadd.f32 %v887_v42, %v711_v43 }
 0x1d1   :  { %v1015_v46 = vpop.f32.mrf.mxu1 }
 0x1d2   :  { %v717_v47 = vmax.f32 %v712_v45, 0.0 }
 0x1d3   :  { %v714_v48 = vpop.f32.mrf.mxu1 }
 0x1d4   :  { %v718_v49 = vpack.c.bf16 %v717_v47, %v717_v47 }
 0x1d5   :  { %v1016_v50 = vpop.f32.mrf.mxu1 }
 0x1d6   :  { %1034 = vmatmul.mubr.bf16.vlgmr.msra.gmra.mxu0 %v718_v49 }
 0x296   :  { %v824_v51 = vpop.f32.mrf.mxu0 }
 0x297   :  { %v825_v52 = vadd.f32 %v896_v44, %v824_v51 }
 0x298   :  { %v1035_v53 = vpop.f32.mrf.mxu0 }
 0x299   :  { %v830_v54 = vpack.c.bf16 %v825_v52, %v825_v52 }
 0x29a   :  { %v827_v55 = vpop.f32.mrf.mxu0 }
 0x29b   :  { %831 = vst [vmem:[%s1404_s7] sm:$0xf] %v830_v54 }
 0x29c   :  { %v1036_v56 = vpop.f32.mrf.mxu0 }

</bundles_post_ra>
